<compile_context>
chip_gen: v6e
topology: v6e:2x2x1
jax: 0.10.0
libtpu: 0.0.40
codegen_flags: <defaults>
</compile_context>

<pallas_src>
import jax
import jax.numpy as jnp
from jax.experimental import pallas as pl
from jax.experimental.pallas import tpu as pltpu


def _round_up(x, m):
    return ((x + m - 1) // m) * m


def _vmem_limit_bytes():
    """Generation-dependent scoped-VMEM limit (~75% of physical).

    v5e/v6e: 128 MiB physical -> ~96 MiB; v7x: 64 MiB -> ~48 MiB.
    Falls back to a v7x-safe 48 MiB if the query is unavailable.
    """
    try:
        cap = int(pltpu.get_tpu_info().vmem_capacity_bytes)
    except Exception:
        cap = 64 * 1024 * 1024
    return min(cap * 3 // 4, 96 * 1024 * 1024)


_VMEM_LIMIT = _vmem_limit_bytes()
_VMEM_BUDGET = _VMEM_LIMIT // 2      # per-step block budget (pipeline headroom)


# --------------------------------------------------------------------------
# Kernel 1: frame encoder.  Pooling + patchification are pre-folded into the
# weight, so this is a single mem-bound matmul over frame pixels.
#   out = cast_bf16( x_flat @ W_eff + b )
# --------------------------------------------------------------------------
def _patch_embed_kernel(x_ref, w_ref, b_ref, out_ref):
    # x: [TM, K_eff] f32 (cast to bf16 on the VPU — frame_input is streamed
    # from HBM exactly once; no separate cast / pooling pass).
    x = x_ref[...].astype(jnp.bfloat16)
    acc = jnp.dot(x, w_ref[...], preferred_element_type=jnp.float32) + b_ref[...]
    out_ref[...] = acc.astype(out_ref.dtype)        # bf16 writeback


def frame_encoder_forward(frame_input, frame_mask, fe_params, patch_size):
    B, T, C, H, W = frame_input.shape
    ps = patch_size
    Ph, Pw = H // ps, W // ps
    D_pad = fe_params["w_patch"].shape[1]
    BT = B * T
    K_eff = C * H * W

    # Fold patch extraction + per-frame mean pool into the weight:
    #   W_eff[(c, ph*ps+i, pw*ps+j), :] = W[(c, i, j), :] / (Ph*Pw)
    # (exact for this purely linear synthetic patch embedding).
    w = fe_params["w_patch"].reshape(C, ps, ps, D_pad) * (1.0 / (Ph * Pw))
    w_eff = jnp.broadcast_to(w[:, None, :, None, :, :],
                             (C, Ph, ps, Pw, ps, D_pad))
    w_eff = w_eff.reshape(K_eff, D_pad).astype(jnp.bfloat16)

    x_flat = frame_input.reshape(BT, K_eff)         # contiguous view, free

    # Largest row tile that fits the per-step VMEM budget (mem-bound matmul;
    # larger tiles amortize the ~0.35 us per-grid-step overhead).
    # TODO(synk): for very large C*H*W also tile K_eff with an "arbitrary"
    # reduction axis instead of only shrinking tm.
    def fe_bytes(t):
        return (2 * (t * K_eff * 4 + t * D_pad * 2)      # dbl-buffered in/out
                + 2 * (K_eff * D_pad * 2 + D_pad * 4))   # weights + bias
    tm = 512
    while tm > 8 and fe_bytes(tm) > _VMEM_BUDGET:
        tm //= 2
    tm = min(tm, _round_up(BT, 8))
    rows = _round_up(BT, tm)
    if rows != BT:
        x_flat = jnp.pad(x_flat, ((0, rows - BT), (0, 0)))

    out = pl.pallas_call(
        _patch_embed_kernel,
        out_shape=jax.ShapeDtypeStruct((rows, D_pad), jnp.bfloat16),
        grid=(rows // tm,),
        in_specs=[
            pl.BlockSpec((tm, K_eff), lambda i: (i, 0)),
            pl.BlockSpec((K_eff, D_pad), lambda i: (0, 0)),   # grid-invariant
            pl.BlockSpec((1, D_pad), lambda i: (0, 0)),       # grid-invariant
        ],
        out_specs=pl.BlockSpec((tm, D_pad), lambda i: (i, 0)),
        compiler_params=pltpu.CompilerParams(
            dimension_semantics=("parallel",),
            vmem_limit_bytes=_VMEM_LIMIT,
        ),
    )(x_flat, w_eff, fe_params["b_patch"])

    visual_emb = out[:BT].reshape(B, T, D_pad)      # bf16; lanes D..D_pad == 0
    visual_attn_mask = frame_mask.astype(jnp.float32)
    return visual_emb, visual_attn_mask


# --------------------------------------------------------------------------
# Kernel 2: fused per-sub-model heads (single pallas_call, grid over
# (batch tiles, models)).
#   h_v = relu(x_vis @ W1 + b1) ; h_t = relu(x_txt @ W1 + b1)
#   pooled = (sum_s m_s * h_s) / (sum_s m_s)     (split over vis/txt)
#   logits = pooled @ W2 + b2
# --------------------------------------------------------------------------
def _fusion_head_kernel(xv_ref, mv_ref, xt_ref, mt_ref,
                        w1_ref, b1_ref, w2_ref, b2_ref, out_ref):
    w1 = w1_ref[...]                                  # [D_pad, H_pad] bf16
    b1 = b1_ref[...]                                  # [1, H_pad] f32
    mv = mv_ref[...]                                  # [TB, T] f32
    mt = mt_ref[...]                                  # [TB, L] f32

    # Visual branch is fully reduced before the text branch is materialized,
    # so only one full-length f32 activation is live at a time (less vreg /
    # VMEM pressure, esp. on v5e with its single vector-store slot).
    hv = jnp.einsum("btd,dh->bth", xv_ref[...], w1,
                    preferred_element_type=jnp.float32)
    hv = jnp.maximum(hv + b1, 0.0)
    num = jnp.sum(hv * mv[:, :, None], axis=1)        # [TB, H_pad]

    ht = jnp.einsum("bld,dh->blh", xt_ref[...], w1,
                    preferred_element_type=jnp.float32)
    ht = jnp.maximum(ht + b1, 0.0)
    num = num + jnp.sum(ht * mt[:, :, None], axis=1)

    den = (jnp.sum(mv, axis=1, keepdims=True)
           + jnp.sum(mt, axis=1, keepdims=True) + 1e-6)
    pooled = num * pl.reciprocal(den, approx=False)    # exact; den is [TB,1]

    out_ref[...] = (jnp.dot(pooled.astype(jnp.bfloat16), w2_ref[...],
                            preferred_element_type=jnp.float32)
                    + b2_ref[...])                     # [TB, C_pad] f32


def fused_heads_forward(visual_emb, visual_attn_mask, text_input_ids,
                        text_attention_mask, text_segment_ids,
                        hp, num_classes_list):
    B, T, Dv = visual_emb.shape
    L = text_input_ids.shape[1]
    M, D_pad, H_pad = hp["w1"].shape
    C_pad = hp["w2"].shape[2]

    if Dv < D_pad:   # non-end2end path: precomputed features, pad lane dim
        visual_emb = jnp.pad(visual_emb, ((0, 0), (0, 0), (0, D_pad - Dv)))
    xv = visual_emb.astype(jnp.bfloat16)   # no-op when produced by kernel 1
    mv = visual_attn_mask.astype(jnp.float32)

    # Per-sub-model text embedding lookup (gather stays in XLA glue).
    # TODO(synk): at production vocab*L sizes, gather in-kernel from a
    # scalar-prefetched id table so xt never materializes in HBM.
    word = jnp.take(hp["word_emb"], text_input_ids, axis=1)   # [M,B,L,D_pad]
    seg = jnp.take(hp["seg_emb"], text_segment_ids, axis=1)
    xt = (word + seg).astype(jnp.bfloat16)
    mt = text_attention_mask.astype(jnp.float32)

    # Batch tile chosen so double-buffered blocks + live f32 activations stay
    # under the per-step VMEM budget (bounds usage on v7x's 64 MiB VMEM).
    # TODO(synk): for production L >= 128 / H >= 1024, add an innermost
    # "arbitrary" grid axis over sequence chunks with pl.when-guarded
    # accumulators instead of only shrinking tb.
    def head_bytes(t):
        blocks = (t * T * D_pad * 2 + t * T * 4
                  + t * L * D_pad * 2 + t * L * 4
                  + D_pad * H_pad * 2 + H_pad * 4
                  + H_pad * C_pad * 2 + C_pad * 4
                  + t * C_pad * 4)
        live_f32 = t * max(T, L) * H_pad * 4
        return 2 * blocks + live_f32
    tb = 128
    while tb > 8 and head_bytes(tb) > _VMEM_BUDGET:
        tb //= 2
    tb = min(tb, _round_up(B, 8))
    bpad = _round_up(B, tb)
    if bpad != B:
        pb = bpad - B
        xv = jnp.pad(xv, ((0, pb), (0, 0), (0, 0)))
        mv = jnp.pad(mv, ((0, pb), (0, 0)))
        xt = jnp.pad(xt, ((0, 0), (0, pb), (0, 0), (0, 0)))
        mt = jnp.pad(mt, ((0, pb), (0, 0)))

    # Grid: (batch tiles, models).  The shared visual/mask blocks' index_maps
    # ignore the model axis, so they are not re-streamed per sub-model.  Each
    # (b, m) writes a disjoint output block -> both axes "parallel" so v7x
    # can shard the model axis across its 2 TensorCores even when bpad//tb==1.
    # TODO(synk): for production-size heads (weights >> activation tiles),
    # swap to (model outer, batch inner) so weights stay resident instead.
    out = pl.pallas_call(
        _fusion_head_kernel,
        out_shape=jax.ShapeDtypeStruct((M, bpad, C_pad), jnp.float32),
        grid=(bpad // tb, M),
        in_specs=[
            pl.BlockSpec((tb, T, D_pad), lambda b, m: (b, 0, 0)),       # shared
            pl.BlockSpec((tb, T), lambda b, m: (b, 0)),                 # shared
            pl.BlockSpec((None, tb, L, D_pad), lambda b, m: (m, b, 0, 0)),
            pl.BlockSpec((tb, L), lambda b, m: (b, 0)),                 # shared
            pl.BlockSpec((None, D_pad, H_pad), lambda b, m: (m, 0, 0)),
            pl.BlockSpec((None, 1, H_pad), lambda b, m: (m, 0, 0)),
            pl.BlockSpec((None, H_pad, C_pad), lambda b, m: (m, 0, 0)),
            pl.BlockSpec((None, 1, C_pad), lambda b, m: (m, 0, 0)),
        ],
        out_specs=pl.BlockSpec((None, tb, C_pad), lambda b, m: (m, b, 0)),
        compiler_params=pltpu.CompilerParams(
            dimension_semantics=("parallel", "parallel"),
            vmem_limit_bytes=_VMEM_LIMIT,
        ),
    )(xv, mv, xt, mt, hp["w1"], hp["b1"], hp["w2"], hp["b2"])

    # Slice away batch padding and class-lane padding per sub-model.
    return [out[i, :B, :nc] for i, nc in enumerate(num_classes_list)]


# --------------------------------------------------------------------------
# Model_Stack equivalent
# --------------------------------------------------------------------------
class ModelStackPallas:
    def __init__(self, config, num_classes_list, end2end=True, seed=42):
        self.end2end = end2end
        self.frame_encoder_arch = config["frame_encoder_arch"]
        self.frame_emb_type = config["frame_emb_type"]
        self.patch_size = config["patch_size"]
        self.num_classes_list = list(num_classes_list)

        D = config["hidden"]
        Hdim = config["ffn_hidden"]
        vocab = config["vocab_size"]
        n_seg = config["num_segments"]
        K = config["in_channels"] * self.patch_size * self.patch_size
        M = len(num_classes_list)
        C_max = max(num_classes_list)

        D_pad = _round_up(D, 128)
        H_pad = _round_up(Hdim, 128)
        C_pad = _round_up(C_max, 128)

        key = jax.random.PRNGKey(seed)
        keys = jax.random.split(key, 2 + 6 * M)
        ki = iter(keys)

        def padded(k, shape, pad_to):
            w = jax.random.normal(k, shape, jnp.float32) * 0.02
            return jnp.pad(w, [(0, p - s) for s, p in zip(shape, pad_to)])

        # TODO(synk): real MViT / video-swin / CLIP-ViT checkpoints cannot be
        # loaded here; the encoder is a deterministic synthetic patch embed,
        # and the pool-into-weight fold is only exact for this linear encoder.
        if end2end:
            self.fe_params = {
                "w_patch": padded(next(ki), (K, D), (K, D_pad)),   # f32
                "b_patch": padded(next(ki), (1, D), (1, D_pad)),
            }
        else:
            self.fe_params = None
            next(ki); next(ki)

        we, se, w1, b1, w2, b2 = [], [], [], [], [], []
        for Ci in num_classes_list:
            we.append(padded(next(ki), (vocab, D), (vocab, D_pad)))
            se.append(padded(next(ki), (n_seg, D), (n_seg, D_pad)))
            w1.append(padded(next(ki), (D, Hdim), (D_pad, H_pad)).astype(jnp.bfloat16))
            b1.append(padded(next(ki), (1, Hdim), (1, H_pad)))
            w2.append(padded(next(ki), (Hdim, Ci), (H_pad, C_pad)).astype(jnp.bfloat16))
            b2.append(padded(next(ki), (1, Ci), (1, C_pad)))

        # Stacked across sub-models so all heads run in one pallas_call.
        self.head_params = {
            "word_emb": jnp.stack(we), "seg_emb": jnp.stack(se),
            "w1": jnp.stack(w1), "b1": jnp.stack(b1),
            "w2": jnp.stack(w2), "b2": jnp.stack(b2),
        }

    def __call__(self, frame_input, frame_mask, text_input_ids,
                 text_attention_mask, text_segment_ids):
        visual_emb, visual_attn_mask = frame_input, frame_mask
        if self.end2end:
            visual_emb, visual_attn_mask = frame_encoder_forward(
                frame_input, frame_mask, self.fe_params, self.patch_size)
        return fused_heads_forward(
            visual_emb, visual_attn_mask, text_input_ids,
            text_attention_mask, text_segment_ids,
            self.head_params, self.num_classes_list)


# --------------------------------------------------------------------------
if __name__ == "__main__":
    config = {
        "frame_encoder_arch": "clip_vit",   # synthetic stand-in
        "frame_emb_type": "frame",
        "patch_size": 8,
        "in_channels": 3,
        "hidden": 32,
        "ffn_hidden": 64,
        "vocab_size": 100,
        "num_segments": 2,
    }
    stack = ModelStackPallas(config, num_classes_list=[8, 16], end2end=True)

    B, T, Cc, Himg, Wimg, L = 2, 4, 3, 16, 16, 8
    key = jax.random.PRNGKey(0)
    k1, k2, k3 = jax.random.split(key, 3)

    frame_input = jax.random.normal(k1, (B, T, Cc, Himg, Wimg), jnp.float32)
    frame_mask = jnp.ones((B, T), jnp.float32)
    text_input_ids = jax.random.randint(k2, (B, L), 0, config["vocab_size"],
                                        dtype=jnp.int32)
    text_attention_mask = (jnp.arange(L)[None, :] < 6).astype(jnp.int32)
    text_attention_mask = jnp.broadcast_to(text_attention_mask, (B, L))
    text_segment_ids = (jnp.arange(L)[None, :] >= 4).astype(jnp.int32)
    text_segment_ids = jnp.broadcast_to(text_segment_ids, (B, L))

    outputs = stack(frame_input, frame_mask, text_input_ids,
                    text_attention_mask, text_segment_ids)

    for o in outputs:
        jax.block_until_ready(o)
    assert outputs[0].shape == (B, 8) and outputs[1].shape == (B, 16)
    assert all(jnp.all(jnp.isfinite(o)) for o in outputs)
    print("KERNEL_OK")
</pallas_src>

<mosaic_0001>
module attributes {stable_mosaic.version = 11 : i64} {
  func.func @_patch_embed_kernel(%arg0: i32, %arg1: memref<8x768xf32, #tpu.memory_space<vmem>>, %arg2: memref<768x128xbf16, #tpu.memory_space<vmem>>, %arg3: memref<1x128xf32, #tpu.memory_space<vmem>>, %arg4: memref<8x128xbf16, #tpu.memory_space<vmem>>) attributes {dimension_semantics = [#tpu.dimension_semantics<parallel>], iteration_bounds = array<i64: 1>, scalar_prefetch = 0 : i64, scratch_operands = 0 : i64, tpu.core_type = #tpu.core_type<tc>, window_params = [{transform_indices = @transform_0, window_bounds = array<i64: 8, 768>}, {pipeline_mode = #tpu.pipeline_mode<synchronous>, transform_indices = @transform_1, window_bounds = array<i64: 768, 128>}, {pipeline_mode = #tpu.pipeline_mode<synchronous>, transform_indices = @transform_2, window_bounds = array<i64: 1, 128>}, {transform_indices = @transform_3, window_bounds = array<i64: 8, 128>}]} {
    %c0 = arith.constant 0 : index
    %c0_0 = arith.constant 0 : index
    %0 = vector.load %arg1[%c0, %c0_0] : memref<8x768xf32, #tpu.memory_space<vmem>>, vector<8x768xf32>
    %1 = arith.truncf %0 : vector<8x768xf32> to vector<8x768xbf16>
    %c0_1 = arith.constant 0 : index
    %c0_2 = arith.constant 0 : index
    %2 = vector.load %arg2[%c0_1, %c0_2] : memref<768x128xbf16, #tpu.memory_space<vmem>>, vector<768x128xbf16>
    %cst = arith.constant dense<0.000000e+00> : vector<8x128xf32>
    %3 = tpu.matmul %1, %2, %cst {dimension_numbers = #tpu.dot_dimension_numbers<[1], [0], [0], [1], [0, 0, 1, 1], [], []>} : vector<8x768xbf16>, vector<768x128xbf16>, vector<8x128xf32> -> vector<8x128xf32>
    %c0_3 = arith.constant 0 : index
    %c0_4 = arith.constant 0 : index
    %4 = vector.load %arg3[%c0_3, %c0_4] : memref<1x128xf32, #tpu.memory_space<vmem>>, vector<1x128xf32>
    %5 = vector.broadcast %4 : vector<1x128xf32> to vector<8x128xf32>
    %6 = arith.addf %3, %5 : vector<8x128xf32>
    %7 = arith.truncf %6 : vector<8x128xf32> to vector<8x128xbf16>
    %c0_5 = arith.constant 0 : index
    %c0_6 = arith.constant 0 : index
    %8 = vector.load %arg4[%c0_5, %c0_6] : memref<8x128xbf16, #tpu.memory_space<vmem>>, vector<8x128xbf16>
    tpu.vector_store %arg4[%c0_5, %c0_6], %7 {strides = array<i32>} : memref<8x128xbf16, #tpu.memory_space<vmem>>, vector<8x128xbf16>,
    return
  }
  func.func @transform_0(%arg0: i32) -> (i32, i32) {
    %c0_i32 = arith.constant 0 : i32
    %c0_i32_0 = arith.constant 0 : i32
    return %arg0, %c0_i32 : i32, i32
  }
  func.func @transform_1(%arg0: i32) -> (i32, i32) {
    %c0_i32 = arith.constant 0 : i32
    %c0_i32_0 = arith.constant 0 : i32
    %c0_i32_1 = arith.constant 0 : i32
    return %c0_i32, %c0_i32_0 : i32, i32
  }
  func.func @transform_2(%arg0: i32) -> (i32, i32) {
    %c0_i32 = arith.constant 0 : i32
    %c0_i32_0 = arith.constant 0 : i32
    %c0_i32_1 = arith.constant 0 : i32
    return %c0_i32, %c0_i32_0 : i32, i32
  }
  func.func @transform_3(%arg0: i32) -> (i32, i32) {
    %c0_i32 = arith.constant 0 : i32
    %c0_i32_0 = arith.constant 0 : i32
    return %arg0, %c0_i32 : i32, i32
  }
}

</mosaic_0001>

<bundles_post_ra>
// kernel: tpu_custom_call.1
= control target key start
LH: loop header
LB: loop body
LE: loop exit
PB: predicated region body
PF: predicated region fallthrough
CT: control target
= control target key end

     0   :  { %8 = vsyncpa [#allocation3], 0  ;;  %s854_s0 = inlined_call_operand.hbm [shape: f32[8,768], index: 0, kind: input, shape index: {}]   ;;  %s855_s1 = inlined_call_operand.hbm [shape: bf16[768,128], index: 1, kind: input, shape index: {}]   ;;  %s856_s2 = inlined_call_operand.vmem [shape: f32[1,128], index: 2, kind: input, shape index: {}]   ;;  %s857_s3 = inlined_call_operand.hbm [shape: bf16[8,128], index: 3, kind: output, shape index: {}]  }
   0x1   :  { %9 = vsyncpa [#allocation6], 0 }
   0x2   :  { %10 = vsyncpa [#allocation4], 0  ;;  %s817_s12 = smov [#allocation2]   ;;  %s818_s14 = smov [#allocation5]  }
   0x3   :  { %s17_s13 = sshll.u32 %s817_s12, 4  ;;  %s26_s15 = sshll.u32 %s818_s14, 4  ;;  %s18_s13 = int_to_ptr.vmem [resolvable:$true] %s17_s13  ;;  %s27_s15 = int_to_ptr.vmem [resolvable:$true] %s26_s15 }
   0x4   :  { %s759_s16 = scalar_lea.vmem %s18_s13, 768  ;;  %p764_p1 = scmp.lt.s32.totalorder %s18_s13, %s18_s13 }
   0x5   :  { %p760_p0 = scmp.ne.s32.totalorder %s18_s13, %s759_s16  ;;  %p765_p2 = scmp.lt.s32.totalorder %s759_s16, %s759_s16 }
   0x7   :  { %p766_p3 = por %p765_p2, %p764_p1 }
   0x9   :  { %p767_p4 = pnand %p766_p3, %p760_p0 }
   0xb   :  { %770 = shalt.err (!%p767_p4)
}
   0xc   :  { %20 = dma.hbm_to_vmem [thread:$0]  %s854_s0, 768, %s18_s13, [#allocation3]  }
   0xd   :  { %s779_s19 = scalar_lea.vmem %s27_s15, 6144  ;;  %p784_p6 = scmp.lt.s32.totalorder %s27_s15, %s27_s15 }
   0xe   :  { %p780_p5 = scmp.ne.s32.totalorder %s27_s15, %s779_s19  ;;  %p785_p7 = scmp.lt.s32.totalorder %s779_s19, %s779_s19 }
  0x10   :  { %p786_p8 = por %p785_p7, %p784_p6 }
  0x12   :  { %p787_p9 = pnand %p786_p8, %p780_p5 }
  0x14   :  { %790 = shalt.err (!%p787_p9)
}
  0x15   :  { %s819_s20 = smov 64   ;;  %s820_s21 = smov 4  }
  0x16   :  { %32 = dma.hbm_to_vmem [thread:$0]  %s855_s1, 6144, %s27_s15, [#allocation6], %s819_s20, %s819_s20, %s820_s21  }
  0x17   :  { %811 = dma.done.wait [#allocation3], 768  }
  0x18   :  { %812 = vsyncadd [#allocation3], 4294966528 }
  0x19   :  { %813 = dma.done.wait [#allocation6], 6144  }
  0x1a   :  { %814 = vsyncadd [#allocation6], 4294961152  ;;  %v703_v0 = vld [vmem:[#allocation5 + $0x78] sm:$0xff]   ;;  %v707_v4 = vld [vmem:[#allocation5 + $0x70] sm:$0xff]   ;;  %s821_s24 = smov [#allocation7]  }
  0x1b   :  { %v704_v1 = vld [vmem:[#allocation5 + $0x38] sm:$0xff]   ;;  %632 = vmatprep.subr.bf16.mxu0 %v703_v0  ;;  %v708_v5 = vld [vmem:[#allocation5 + $0x30] sm:$0xff]   ;;  %v711_v8 = vld [vmem:[#allocation5 + $0x68] sm:$0xff]   ;;  %s573_s25 = sshll.u32 %s821_s24, 4  ;;  %s574_s25 = int_to_ptr.vmem [resolvable:$true] %s573_s25 }
  0x1c   :  { %v705_v2 = vld [vmem:[#allocation5 + $0xf8] sm:$0xff]   ;;  %633 = vmatpush3.bf16.msra.mxu0 %v704_v1  ;;  %v709_v6 = vld [vmem:[#allocation5 + $0xf0] sm:$0xff]   ;;  %v712_v9 = vld [vmem:[#allocation5 + $0x28] sm:$0xff]   ;;  %s791_s26 = scalar_lea.vmem %s574_s25, 64  ;;  %p796_p11 = scmp.lt.s32.totalorder %s574_s25, %s574_s25 }
  0x1d   :  { %v706_v3 = vld [vmem:[#allocation5 + $0xb8] sm:$0xff]   ;;  %654 = vmatprep.subr.bf16.mxu1 %v705_v2  ;;  %634 = vmatprep.subr.bf16.mxu0 %v707_v4  ;;  %v710_v7 = vld [vmem:[#allocation5 + $0xb0] sm:$0xff]   ;;  %v713_v10 = vld [vmem:[#allocation5 + $0xe8] sm:$0xff]   ;;  %p792_p10 = scmp.ne.s32.totalorder %s574_s25, %s791_s26  ;;  %p797_p12 = scmp.lt.s32.totalorder %s791_s26, %s791_s26 }
  0x1e   :  { %655 = vmatpush3.bf16.msra.mxu1 %v706_v3  ;;  %v714_v11 = vld [vmem:[#allocation5 + $0xa8] sm:$0xff]   ;;  %v715_v12 = vld [vmem:[#allocation5 + $0x60] sm:$0xff]   ;;  %v719_v16 = vld [vmem:[#allocation5 + $0x58] sm:$0xff]  }
  0x1f   :  { %656 = vmatprep.subr.bf16.mxu1 %v709_v6  ;;  %v716_v13 = vld [vmem:[#allocation5 + $0x20] sm:$0xff]   ;;  %v720_v17 = vld [vmem:[#allocation5 + $0x18] sm:$0xff]   ;;  %v723_v20 = vld [vmem:[#allocation5 + $0x50] sm:$0xff]   ;;  %p798_p13 = por %p797_p12, %p796_p11 }
  0x20   :  { %635 = vmatpush3.bf16.msra.mxu0 %v708_v5  ;;  %v717_v14 = vld [vmem:[#allocation5 + $0xe0] sm:$0xff]   ;;  %v721_v18 = vld [vmem:[#allocation5 + $0xd8] sm:$0xff]   ;;  %v724_v21 = vld [vmem:[#allocation5 + $0x10] sm:$0xff]  }
  0x21   :  { %636 = vmatprep.subr.bf16.mxu0 %v711_v8  ;;  %v718_v15 = vld [vmem:[#allocation5 + $0xa0] sm:$0xff]   ;;  %v722_v19 = vld [vmem:[#allocation5 + $0x98] sm:$0xff]   ;;  %v725_v22 = vld [vmem:[#allocation5 + $0xd0] sm:$0xff]   ;;  %p799_p0 = pnand %p798_p13, %p792_p10 }
  0x22   :  { %657 = vmatpush3.bf16.msra.mxu1 %v710_v7  ;;  %v726_v23 = vld [vmem:[#allocation5 + $0x90] sm:$0xff]   ;;  %v727_v24 = vld [vmem:[#allocation5 + $0x48] sm:$0xff]   ;;  %v731_v28 = vld [vmem:[#allocation5 + $0x40] sm:$0xff]  }
  0x23   :  { %658 = vmatprep.subr.bf16.mxu1 %v713_v10  ;;  %v728_v25 = vld [vmem:[#allocation5 + $0x8] sm:$0xff]   ;;  %v732_v29 = vld [vmem:[#allocation5] sm:$0xff]   ;;  %v43_v31 = vld [vmem:[#allocation2 + $0x8] sm:$0xff] }
  0x24   :  { %637 = vmatpush3.bf16.msra.mxu0 %v712_v9  ;;  %v729_v26 = vld [vmem:[#allocation5 + $0xc8] sm:$0xff]   ;;  %v733_v30 = vld [vmem:[#allocation5 + $0xc0] sm:$0xff]   ;;  %v49_v32 = vpack.c.bf16 %v43_v31, %v43_v31  ;;  %v42_v34 = vld [vmem:[#allocation2] sm:$0xff] }
  0x25   :  { %638 = vmatprep.subr.bf16.mxu0 %v715_v12  ;;  %v730_v27 = vld [vmem:[#allocation5 + $0x88] sm:$0xff]   ;;  %v734_v33 = vld [vmem:[#allocation5 + $0x80] sm:$0xff]   ;;  %v48_v35 = vpack.c.bf16 %v42_v34, %v42_v34  ;;  %v735_v36 = vld [vmem:[#allocation5 + $0x178] sm:$0xff]  }
  0x26   :  { %659 = vmatpush3.bf16.msra.mxu1 %v714_v11  ;;  %v45_v37 = vld [vmem:[#allocation2 + $0x18] sm:$0xff]  ;;  %477 = vmatprep.mubr.bf16.mxu0 %v49_v32  ;;  %v736_v39 = vld [vmem:[#allocation5 + $0x138] sm:$0xff]   ;;  %v44_v40 = vld [vmem:[#allocation2 + $0x10] sm:$0xff] }
  0x27   :  { %660 = vmatprep.subr.bf16.mxu1 %v717_v14  ;;  %v51_v38 = vpack.c.bf16 %v45_v37, %v45_v37  ;;  %v50_v41 = vpack.c.bf16 %v44_v40, %v44_v40  ;;  %v737_v42 = vld [vmem:[#allocation5 + $0x170] sm:$0xff]   ;;  %v739_v44 = vld [vmem:[#allocation5 + $0x168] sm:$0xff]   ;;  %v741_v46 = vld [vmem:[#allocation5 + $0x160] sm:$0xff]  }
  0x28   :  { %639 = vmatpush3.bf16.msra.mxu0 %v716_v13  ;;  %v738_v43 = vld [vmem:[#allocation5 + $0x130] sm:$0xff]   ;;  %v740_v45 = vld [vmem:[#allocation5 + $0x128] sm:$0xff]   ;;  %v742_v47 = vld [vmem:[#allocation5 + $0x120] sm:$0xff]  }
  0x29   :  { %640 = vmatprep.subr.bf16.mxu0 %v719_v16  ;;  %517 = vmatprep.mubr.bf16.mxu1 %v51_v38  ;;  %v743_v48 = vld [vmem:[#allocation5 + $0x158] sm:$0xff]   ;;  %v745_v50 = vld [vmem:[#allocation5 + $0x150] sm:$0xff]   ;;  %v747_v54 = vld [vmem:[#allocation5 + $0x148] sm:$0xff]  }
  0x2a   :  { %661 = vmatpush3.bf16.msra.mxu1 %v718_v15  ;;  %v744_v49 = vld [vmem:[#allocation5 + $0x118] sm:$0xff]   ;;  %v746_v53 = vld [vmem:[#allocation5 + $0x110] sm:$0xff]   ;;  %v748_v55 = vld [vmem:[#allocation5 + $0x108] sm:$0xff]  }
  0x2b   :  { %662 = vmatprep.subr.bf16.mxu1 %v721_v18  ;;  %v47_v51 = vld [vmem:[#allocation2 + $0x28] sm:$0xff]  ;;  %v749_v56 = vld [vmem:[#allocation5 + $0x140] sm:$0xff]   ;;  %v46_v58 = vld [vmem:[#allocation2 + $0x20] sm:$0xff] }
  0x2c   :  { %641 = vmatpush3.bf16.msra.mxu0 %v720_v17  ;;  %v53_v52 = vpack.c.bf16 %v47_v51, %v47_v51  ;;  %v750_v57 = vld [vmem:[#allocation5 + $0x100] sm:$0xff]   ;;  %v52_v59 = vpack.c.bf16 %v46_v58, %v46_v58  ;;  %v583_v5 = vld [vmem:[%s856_s2] ss:$0 sm:$0xff] }
  0x2d   :  { %642 = vmatprep.subr.bf16.mxu0 %v723_v20 }
  0x2e   :  { %663 = vmatpush3.bf16.msra.mxu1 %v722_v19 }
  0x2f   :  { %664 = vmatprep.subr.bf16.mxu1 %v725_v22 }
  0x30   :  { %643 = vmatpush3.bf16.msra.mxu0 %v724_v21 }
  0x31   :  { %644 = vmatprep.subr.bf16.mxu0 %v727_v24 }
  0x32   :  { %665 = vmatpush3.bf16.msra.mxu1 %v726_v23 }
  0x33   :  { %666 = vmatprep.subr.bf16.mxu1 %v729_v26 }
  0x34   :  { %645 = vmatpush3.bf16.msra.mxu0 %v728_v25 }
  0x35   :  { %646 = vmatprep.subr.bf16.mxu0 %v731_v28 }
  0x36   :  { %667 = vmatpush3.bf16.msra.mxu1 %v730_v27 }
  0x37   :  { %668 = vmatprep.subr.bf16.mxu1 %v733_v30 }
  0x38   :  { %647 = vmatpush3.bf16.msra.mxu0 %v732_v29 }
  0x39   :  { %676 = vmatprep.subr.bf16.mxu0 %v735_v36 }
  0x3a   :  { %669 = vmatpush3.bf16.msra.mxu1 %v734_v33 }
  0x3b   :  { %478 = vmatmul.mubr.bf16.vlgmr.msra.gmra.mxu0 %v48_v35 }
  0x3c   :  { %677 = vmatpush3.bf16.msra.mxu0 %v736_v39  ;;  %557 = vmatprep.mubr.bf16.mxu0 %v53_v52 }
  0x3d   :  { %518 = vmatmul.mubr.bf16.vlgmr.msra.gmra.mxu1 %v50_v41  ;;  %678 = vmatprep.subr.bf16.mxu0 %v737_v42 }
  0x40   :  { %679 = vmatpush3.bf16.msra.mxu0 %v738_v43 }
  0x41   :  { %680 = vmatprep.subr.bf16.mxu0 %v739_v44 }
  0x44   :  { %681 = vmatpush3.bf16.msra.mxu0 %v740_v45 }
  0x45   :  { %682 = vmatprep.subr.bf16.mxu0 %v741_v46 }
  0x48   :  { %683 = vmatpush3.bf16.msra.mxu0 %v742_v47 }
  0x49   :  { %684 = vmatprep.subr.bf16.mxu0 %v743_v48 }
  0x4c   :  { %685 = vmatpush3.bf16.msra.mxu0 %v744_v49 }
  0x4d   :  { %686 = vmatprep.subr.bf16.mxu0 %v745_v50 }
  0x50   :  { %687 = vmatpush3.bf16.msra.mxu0 %v746_v53 }
  0x51   :  { %688 = vmatprep.subr.bf16.mxu0 %v747_v54 }
  0x54   :  { %689 = vmatpush3.bf16.msra.mxu0 %v748_v55 }
  0x55   :  { %690 = vmatprep.subr.bf16.mxu0 %v749_v56 }
  0x58   :  { %691 = vmatpush3.bf16.msra.mxu0 %v750_v57 }
  0x5b   :  { %558 = vmatmul.mubr.bf16.vlgmr.msra.gmra.mxu0 %v52_v59 }
  0xfb   :  { %v648_v60 = vpop.f32.mrf.mxu0 }
  0xfd   :  { %v649_v61 = vpop.f32.mrf.mxu0  ;;  %v670_v62 = vpop.f32.mrf.mxu1 }
  0xfe   :  { %v650_v4 = vadd.f32 %v649_v61, %v648_v60 }
  0xff   :  { %v651_v63 = vpop.f32.mrf.mxu0  ;;  %v671_v0 = vpop.f32.mrf.mxu1 }
 0x100   :  { %v480_v6 = vadd.f32 %v650_v4, %v583_v5  ;;  %v672_v7 = vadd.f32 %v671_v0, %v670_v62 }
 0x101   :  { %v652_v1 = vpop.f32.mrf.mxu0  ;;  %v673_v2 = vpop.f32.mrf.mxu1 }
 0x102   :  { %v520_v10 = vadd.f32 %v672_v7, %v480_v6 }
 0x103   :  { %v674_v3 = vpop.f32.mrf.mxu1 }
 0x11b   :  { %v692_v8 = vpop.f32.mrf.mxu0 }
 0x11d   :  { %v693_v9 = vpop.f32.mrf.mxu0 }
 0x11e   :  { %v694_v11 = vadd.f32 %v693_v9, %v692_v8 }
 0x11f   :  { %v695_v12 = vpop.f32.mrf.mxu0 }
 0x120   :  { %v560_v13 = vadd.f32 %v694_v11, %v520_v10 }
 0x121   :  { %v696_v14 = vpop.f32.mrf.mxu0 }
 0x122   :  { %v565_v15 = vpack.c.bf16 %v560_v13, %v560_v13 }
 0x124   :  { %566 = vst [vmem:[#allocation7] sm:$0xf] %v565_v15 }
 0x125   :  { %802 = shalt.err (!%p799_p0)
}
 0x126   :  { %576 = dma.vmem_to_hbm [thread:$0]  %s574_s25, 64, %s857_s3, [#allocation4]  }
 0x127   :  { %815 = dma.done.wait [#allocation4], 64  }
 0x128   :  { %816 = vsyncadd [#allocation4], 4294967232 }
 0x129   :  { %580 = vsyncpa [#allocation3], 1 }
 0x12a   :  { %581 = vsyncpa [#allocation6], 1 }
 0x12b   :  { %582 = vsyncpa [#allocation4], 1 }

</bundles_post_ra>
